<compile_context>
chip_gen: v5e
topology: v5e:2x2
jax: 0.10.0
libtpu: 0.0.40
codegen_flags: <defaults>
</compile_context>

<pallas_src>
import functools

import jax
import jax.numpy as jnp
from jax.experimental import pallas as pl
from jax.experimental.pallas import tpu as pltpu


_LANE = 128      # lane width (last dim)
_SUBLANE = 8     # f32 sublane tile (second-to-last dim)


def _round_up(n, m):
    return ((n + m - 1) // m) * m


def _cdiv(a, b):
    return -(-a // b)


def _pad2d(a, rows, cols):
    r, c = a.shape
    if r == rows and c == cols:
        return a
    return jnp.pad(a, ((0, rows - r), (0, cols - c)))


def _vmem_capacity_bytes():
    """Generation-aware VMEM capacity; conservative fallback if unavailable."""
    try:
        cap = int(getattr(pltpu.get_tpu_info(), "vmem_capacity_bytes"))
        if cap > 0:
            return cap
    except Exception:
        pass
    return 64 * 1024 * 1024   # v7x per-core VMEM (safe lower bound)


# --------------------------------------------------------------------------- #
# Kernel
# --------------------------------------------------------------------------- #
def _fused_mlp_kernel(*refs, num_layers, sigmoid_output):
    """Whole MLP for one batch tile.

    refs = (x_ref, w0_ref, b0_ref, ..., w{L-1}_ref, b{L-1}_ref, o_ref)
      x_ref : [TM, D0p]       VMEM, mxu dtype (feature dim padded to 128)
      wi_ref: [Dip, D(i+1)p]  VMEM, mxu dtype (stored [in, out], zero-padded)
      bi_ref: [1,  D(i+1)p]   VMEM, f32
      o_ref : [TM, DLp]       VMEM (lane-dense; wrapper slices to true Dout)
    """
    x_ref = refs[0]
    o_ref = refs[-1]
    params = refs[1:-1]

    h = x_ref[...]                                    # already mxu dtype
    for i in range(num_layers):                       # static unroll over layers
        w_ref = params[2 * i]
        b_ref = params[2 * i + 1]
        # MXU matmul; cast the running activation to the weight dtype (no-op
        # for f32 weights, bf16 downcast for the v6e/v7x fast path).
        h = jnp.dot(h.astype(w_ref.dtype), w_ref[...],
                    preferred_element_type=jnp.float32)
        h = h + b_ref[...]                            # f32 bias row-broadcast
        if i < num_layers - 1:
            h = jnp.maximum(h, 0.0)                   # ReLU on VPU, f32
    if sigmoid_output:
        h = jax.nn.sigmoid(h)                         # EUP, final tile only
    o_ref[...] = h.astype(o_ref.dtype)
    # TODO(synk): for num_layers >~ 4 with uniform hidden dims, stack interior
    # weights [L-2, Dh, Dh] and use lax.fori_loop + a VMEM activation scratch
    # to keep vreg pressure flat instead of this static unroll.


# --------------------------------------------------------------------------- #
# Host-side parameter preparation (done once, cached)
# --------------------------------------------------------------------------- #
def _prepare_params(weights, biases, mxu_dtype=jnp.float32):
    """Pad/cast weights & biases once. weights[i]: [d_i, d_{i+1}] ([in, out])."""
    dims = [weights[0].shape[0]] + [w.shape[1] for w in weights]
    dims_pad = [_round_up(d, _LANE) for d in dims]
    flat = []
    for i, (w, b) in enumerate(zip(weights, biases)):
        wp = _pad2d(w.astype(mxu_dtype), dims_pad[i], dims_pad[i + 1])
        bp = _pad2d(b.reshape(1, -1).astype(jnp.float32), 1, dims_pad[i + 1])
        flat += [wp, bp]
    return tuple(flat), tuple(dims), tuple(dims_pad)


# --------------------------------------------------------------------------- #
# Batch-tile selection
# --------------------------------------------------------------------------- #
def _tm_cap(per_row_bytes, resident_bytes, vmem_cap):
    """Largest batch tile (rows) the VMEM budget allows, capped at 512."""
    budget = int(0.8 * vmem_cap)           # headroom for compiler scratch
    avail = budget - resident_bytes
    if avail <= per_row_bytes * _SUBLANE:
        return _SUBLANE
    cap = (avail // per_row_bytes) // _SUBLANE * _SUBLANE
    return max(_SUBLANE, min(512, cap))


def _choose_tm(b_pad0, tm_cap):
    """Pick the batch tile: >=2 tiles when B>=16 (v7x megacore), minimal
    round-up padding for large batches, tiles in the 256..512 sweet spot."""
    if b_pad0 <= tm_cap:
        if b_pad0 < 16:
            return b_pad0                               # tiny batch: one tile
        return _round_up(_cdiv(b_pad0, 2), _SUBLANE)    # 2 tiles, both TCs busy
    lo = min(256, tm_cap)
    best_key, best_tm = None, tm_cap
    for tm in range(tm_cap, lo - 1, -_SUBLANE):
        n_bt = _cdiv(b_pad0, tm)
        waste = n_bt * tm - b_pad0
        key = (waste, n_bt)
        if best_key is None or key < best_key:
            best_key, best_tm = key, tm
    return best_tm


# --------------------------------------------------------------------------- #
# Fused forward
# --------------------------------------------------------------------------- #
def fused_mlp_padded(x, flat_params, dims, dims_pad, sigmoid_output):
    """x: [..., Din]; flat_params: pre-padded (w0, b0, w1, b1, ...)."""
    num_layers = len(dims) - 1
    orig_shape = x.shape
    if x.ndim != 2:
        x = x.reshape(-1, orig_shape[-1])
    B, Din = x.shape
    assert Din == dims[0], f"expected input dim {dims[0]}, got {Din}"
    Dout, Dout_pad = dims[-1], dims_pad[-1]
    mxu_dtype = flat_params[0].dtype
    out_dtype = x.dtype

    # ---- VMEM budgeting (weights x1 via Buffered(1); I/O tiles x2; f32 slab).
    vmem_cap = _vmem_capacity_bytes()
    resident = sum(int(p.size) * p.dtype.itemsize for p in flat_params)
    in_bytes = jnp.dtype(mxu_dtype).itemsize
    out_bytes = jnp.dtype(out_dtype).itemsize
    per_row = (2 * dims_pad[0] * in_bytes          # double-buffered input tile
               + 2 * Dout_pad * out_bytes          # double-buffered output tile
               + max(dims_pad) * 4)                # f32 running activation slab

    # ---- Batch tiling.
    B_pad0 = _round_up(max(B, 1), _SUBLANE)
    TM = _choose_tm(B_pad0, _tm_cap(per_row, resident, vmem_cap))
    B_pad = _round_up(B_pad0, TM)
    n_bt = B_pad // TM

    needed = resident + TM * per_row
    vmem_limit = int(min(max(needed + (4 << 20), 16 << 20), int(0.9 * vmem_cap)))
    # TODO(synk): if `resident` alone exceeds ~60-70% of vmem_cap (e.g. 4096^2
    # f32 layers on v7x's 64 MiB), stream weight K/N tiles via
    # pltpu.emit_pipeline instead of full residency.

    # ---- Lane-dense padded input (cast once on the host side of the call).
    x_p = jnp.pad(x, ((0, B_pad - B), (0, dims_pad[0] - Din))).astype(mxu_dtype)

    # ---- BlockSpecs: batch-tiled activation/output; weights/biases resident
    # with a single buffer (constant block index -> fetched once).
    in_specs = [pl.BlockSpec((TM, dims_pad[0]), lambda i: (i, 0))]
    for li in range(num_layers):
        in_specs.append(pl.BlockSpec(
            (dims_pad[li], dims_pad[li + 1]), lambda i: (0, 0),
            pipeline_mode=pl.Buffered(1)))
        in_specs.append(pl.BlockSpec(
            (1, dims_pad[li + 1]), lambda i: (0, 0),
            pipeline_mode=pl.Buffered(1)))
    out_spec = pl.BlockSpec((TM, Dout_pad), lambda i: (i, 0))

    # ---- Advisory cost estimate for XLA scheduling around the custom call.
    flops = sum(2 * B_pad * dims_pad[i] * dims_pad[i + 1]
                for i in range(num_layers))
    transcendentals = B_pad * Dout_pad if sigmoid_output else 0
    bytes_accessed = (int(x_p.size) * in_bytes + resident
                      + B_pad * Dout_pad * out_bytes)

    kernel = functools.partial(_fused_mlp_kernel, num_layers=num_layers,
                               sigmoid_output=sigmoid_output)

    out_p = pl.pallas_call(
        kernel,
        out_shape=jax.ShapeDtypeStruct((B_pad, Dout_pad), out_dtype),
        grid_spec=pltpu.PrefetchScalarGridSpec(
            num_scalar_prefetch=0,
            grid=(n_bt,),
            in_specs=in_specs,
            out_specs=out_spec,
        ),
        compiler_params=pltpu.CompilerParams(
            dimension_semantics=("parallel",),
            vmem_limit_bytes=vmem_limit,
        ),
        cost_estimate=pl.CostEstimate(
            flops=int(flops),
            transcendentals=int(transcendentals),
            bytes_accessed=int(bytes_accessed),
        ),
    )(x_p, *flat_params)

    out = out_p[:B, :Dout]
    if len(orig_shape) != 2:
        out = out.reshape(orig_shape[:-1] + (Dout,))
    return out


def fused_mlp(x, weights, biases, sigmoid_output=False, mxu_dtype=jnp.float32):
    """Convenience wrapper (pads params on the fly; prefer MLPPallas to cache)."""
    flat, dims, dims_pad = _prepare_params(weights, biases, mxu_dtype)
    return fused_mlp_padded(x, flat, dims, dims_pad, sigmoid_output)


# --------------------------------------------------------------------------- #
# Module mirror
# --------------------------------------------------------------------------- #
class MLPPallas:
    """Mirror of the PyTorch MLP: num_layers Linear layers, ReLU between them,
    optional sigmoid on the output. Forward is one fused Pallas kernel.
    Padded/cast parameters are cached at construction time."""

    def __init__(self, input_dim, hidden_dim, output_dim, num_layers,
                 sigmoid_output=False, key=None, dtype=jnp.float32,
                 mxu_dtype=jnp.float32):
        self.num_layers = num_layers
        self.sigmoid_output = sigmoid_output
        h = [hidden_dim] * (num_layers - 1)
        dims_in = [input_dim] + h
        dims_out = h + [output_dim]
        key = key if key is not None else jax.random.PRNGKey(0)
        self.weights, self.biases = [], []
        for n, k in zip(dims_in, dims_out):
            key, wkey, bkey = jax.random.split(key, 3)
            # Deterministic init mimicking PyTorch Linear's U(-1/sqrt(n), 1/sqrt(n)).
            bound = 1.0 / float(n) ** 0.5
            w = jax.random.uniform(wkey, (n, k), dtype=dtype,
                                   minval=-bound, maxval=bound)  # stored [in, out]
            b = jax.random.uniform(bkey, (k,), dtype=dtype,
                                   minval=-bound, maxval=bound)
            self.weights.append(w)
            self.biases.append(b)
        # Pre-pad / pre-cast ONCE (removes per-call weight repad HBM traffic).
        self.flat_params, self.dims, self.dims_pad = _prepare_params(
            self.weights, self.biases, mxu_dtype)

    def __call__(self, x):
        return fused_mlp_padded(x, self.flat_params, self.dims, self.dims_pad,
                                self.sigmoid_output)


def mlp_ref(x, weights, biases, sigmoid_output):
    """Pure-JAX reference mirroring the PyTorch forward."""
    n = len(weights)
    for i, (w, b) in enumerate(zip(weights, biases)):
        y = x @ w + b
        x = jax.nn.relu(y) if i < n - 1 else y
    if sigmoid_output:
        x = jax.nn.sigmoid(x)
    return x


if __name__ == "__main__":
    key = jax.random.PRNGKey(0)
    xkey, x2key, pkey = jax.random.split(key, 3)

    batch, input_dim, hidden_dim, output_dim, num_layers = 8, 32, 64, 16, 3
    sigmoid_output = True

    x = jax.random.normal(xkey, (batch, input_dim), dtype=jnp.float32)

    mlp = MLPPallas(input_dim, hidden_dim, output_dim, num_layers,
                    sigmoid_output=sigmoid_output, key=pkey)

    # Single-tile small batch.
    out = jax.block_until_ready(mlp(x))
    ref = mlp_ref(x, mlp.weights, mlp.biases, sigmoid_output)
    assert out.shape == (batch, output_dim)
    assert jnp.allclose(out, ref, atol=1e-5, rtol=1e-5), "mismatch vs reference (f32)"

    # Multi-tile batch path (2 batch tiles, trailing padded rows sliced off).
    x2 = jax.random.normal(x2key, (264, input_dim), dtype=jnp.float32)
    out2 = jax.block_until_ready(mlp(x2))
    ref2 = mlp_ref(x2, mlp.weights, mlp.biases, sigmoid_output)
    assert out2.shape == (264, output_dim)
    assert jnp.allclose(out2, ref2, atol=1e-5, rtol=1e-5), "mismatch vs reference (tiled)"

    # bf16-on-MXU fast path (v6e/v7x); f32 accumulation, looser tolerance.
    mlp_bf16 = MLPPallas(input_dim, hidden_dim, output_dim, num_layers,
                         sigmoid_output=sigmoid_output, key=pkey,
                         mxu_dtype=jnp.bfloat16)
    out_bf16 = jax.block_until_ready(mlp_bf16(x))
    assert out_bf16.shape == (batch, output_dim)
    assert jnp.allclose(out_bf16, ref, atol=5e-2, rtol=5e-2), "mismatch vs reference (bf16)"

    print("KERNEL_OK")
</pallas_src>

<mosaic_0001>
module attributes {stable_mosaic.version = 11 : i64} {
  func.func @_fused_mlp_kernel(%arg0: i32, %arg1: memref<8x128xf32, #tpu.memory_space<vmem>>, %arg2: memref<128x128xf32, #tpu.memory_space<vmem>>, %arg3: memref<1x128xf32, #tpu.memory_space<vmem>>, %arg4: memref<128x128xf32, #tpu.memory_space<vmem>>, %arg5: memref<1x128xf32, #tpu.memory_space<vmem>>, %arg6: memref<128x128xf32, #tpu.memory_space<vmem>>, %arg7: memref<1x128xf32, #tpu.memory_space<vmem>>, %arg8: memref<8x128xf32, #tpu.memory_space<vmem>>) attributes {dimension_semantics = [#tpu.dimension_semantics<parallel>], iteration_bounds = array<i64: 1>, scalar_prefetch = 0 : i64, scratch_operands = 0 : i64, tpu.core_type = #tpu.core_type<tc>, window_params = [{transform_indices = @transform_0, window_bounds = array<i64: 8, 128>}, {pipeline_mode = #tpu.pipeline_mode<synchronous>, transform_indices = @transform_1, window_bounds = array<i64: 128, 128>}, {pipeline_mode = #tpu.pipeline_mode<synchronous>, transform_indices = @transform_2, window_bounds = array<i64: 1, 128>}, {pipeline_mode = #tpu.pipeline_mode<synchronous>, transform_indices = @transform_3, window_bounds = array<i64: 128, 128>}, {pipeline_mode = #tpu.pipeline_mode<synchronous>, transform_indices = @transform_4, window_bounds = array<i64: 1, 128>}, {pipeline_mode = #tpu.pipeline_mode<synchronous>, transform_indices = @transform_5, window_bounds = array<i64: 128, 128>}, {pipeline_mode = #tpu.pipeline_mode<synchronous>, transform_indices = @transform_6, window_bounds = array<i64: 1, 128>}, {transform_indices = @transform_7, window_bounds = array<i64: 8, 128>}]} {
    %c0 = arith.constant 0 : index
    %c0_0 = arith.constant 0 : index
    %0 = vector.load %arg1[%c0, %c0_0] : memref<8x128xf32, #tpu.memory_space<vmem>>, vector<8x128xf32>
    %c0_1 = arith.constant 0 : index
    %c0_2 = arith.constant 0 : index
    %1 = vector.load %arg2[%c0_1, %c0_2] : memref<128x128xf32, #tpu.memory_space<vmem>>, vector<128x128xf32>
    %cst = arith.constant dense<0.000000e+00> : vector<8x128xf32>
    %2 = tpu.matmul %0, %1, %cst {dimension_numbers = #tpu.dot_dimension_numbers<[1], [0], [0], [1], [0, 0, 1, 1], [], []>} : vector<8x128xf32>, vector<128x128xf32>, vector<8x128xf32> -> vector<8x128xf32>
    %c0_3 = arith.constant 0 : index
    %c0_4 = arith.constant 0 : index
    %3 = vector.load %arg3[%c0_3, %c0_4] : memref<1x128xf32, #tpu.memory_space<vmem>>, vector<1x128xf32>
    %4 = vector.broadcast %3 : vector<1x128xf32> to vector<8x128xf32>
    %5 = arith.addf %2, %4 : vector<8x128xf32>
    %cst_5 = arith.constant 0.000000e+00 : f32
    %6 = vector.broadcast %cst_5 : f32 to vector<8x128xf32>
    %7 = arith.maximumf %5, %6 : vector<8x128xf32>
    %c0_6 = arith.constant 0 : index
    %c0_7 = arith.constant 0 : index
    %8 = vector.load %arg4[%c0_6, %c0_7] : memref<128x128xf32, #tpu.memory_space<vmem>>, vector<128x128xf32>
    %cst_8 = arith.constant dense<0.000000e+00> : vector<8x128xf32>
    %9 = tpu.matmul %7, %8, %cst_8 {dimension_numbers = #tpu.dot_dimension_numbers<[1], [0], [0], [1], [0, 0, 1, 1], [], []>} : vector<8x128xf32>, vector<128x128xf32>, vector<8x128xf32> -> vector<8x128xf32>
    %c0_9 = arith.constant 0 : index
    %c0_10 = arith.constant 0 : index
    %10 = vector.load %arg5[%c0_9, %c0_10] : memref<1x128xf32, #tpu.memory_space<vmem>>, vector<1x128xf32>
    %11 = vector.broadcast %10 : vector<1x128xf32> to vector<8x128xf32>
    %12 = arith.addf %9, %11 : vector<8x128xf32>
    %cst_11 = arith.constant 0.000000e+00 : f32
    %13 = vector.broadcast %cst_11 : f32 to vector<8x128xf32>
    %14 = arith.maximumf %12, %13 : vector<8x128xf32>
    %c0_12 = arith.constant 0 : index
    %c0_13 = arith.constant 0 : index
    %15 = vector.load %arg6[%c0_12, %c0_13] : memref<128x128xf32, #tpu.memory_space<vmem>>, vector<128x128xf32>
    %cst_14 = arith.constant dense<0.000000e+00> : vector<8x128xf32>
    %16 = tpu.matmul %14, %15, %cst_14 {dimension_numbers = #tpu.dot_dimension_numbers<[1], [0], [0], [1], [0, 0, 1, 1], [], []>} : vector<8x128xf32>, vector<128x128xf32>, vector<8x128xf32> -> vector<8x128xf32>
    %c0_15 = arith.constant 0 : index
    %c0_16 = arith.constant 0 : index
    %17 = vector.load %arg7[%c0_15, %c0_16] : memref<1x128xf32, #tpu.memory_space<vmem>>, vector<1x128xf32>
    %18 = vector.broadcast %17 : vector<1x128xf32> to vector<8x128xf32>
    %19 = arith.addf %16, %18 : vector<8x128xf32>
    %20 = arith.negf %19 : vector<8x128xf32>
    %21 = math.exp %20 : vector<8x128xf32>
    %cst_17 = arith.constant 1.000000e+00 : f32
    %22 = vector.broadcast %cst_17 : f32 to vector<8x128xf32>
    %23 = arith.addf %22, %21 : vector<8x128xf32>
    %24 = arith.divf %22, %23 : vector<8x128xf32>
    %c0_18 = arith.constant 0 : index
    %c0_19 = arith.constant 0 : index
    %25 = vector.load %arg8[%c0_18, %c0_19] : memref<8x128xf32, #tpu.memory_space<vmem>>, vector<8x128xf32>
    tpu.vector_store %arg8[%c0_18, %c0_19], %24 {strides = array<i32>} : memref<8x128xf32, #tpu.memory_space<vmem>>, vector<8x128xf32>,
    return
  }
  func.func @transform_0(%arg0: i32) -> (i32, i32) {
    %c0_i32 = arith.constant 0 : i32
    %c0_i32_0 = arith.constant 0 : i32
    return %arg0, %c0_i32 : i32, i32
  }
  func.func @transform_1(%arg0: i32) -> (i32, i32) {
    %c0_i32 = arith.constant 0 : i32
    %c0_i32_0 = arith.constant 0 : i32
    %c0_i32_1 = arith.constant 0 : i32
    return %c0_i32, %c0_i32_0 : i32, i32
  }
  func.func @transform_2(%arg0: i32) -> (i32, i32) {
    %c0_i32 = arith.constant 0 : i32
    %c0_i32_0 = arith.constant 0 : i32
    %c0_i32_1 = arith.constant 0 : i32
    return %c0_i32, %c0_i32_0 : i32, i32
  }
  func.func @transform_3(%arg0: i32) -> (i32, i32) {
    %c0_i32 = arith.constant 0 : i32
    %c0_i32_0 = arith.constant 0 : i32
    %c0_i32_1 = arith.constant 0 : i32
    return %c0_i32, %c0_i32_0 : i32, i32
  }
  func.func @transform_4(%arg0: i32) -> (i32, i32) {
    %c0_i32 = arith.constant 0 : i32
    %c0_i32_0 = arith.constant 0 : i32
    %c0_i32_1 = arith.constant 0 : i32
    return %c0_i32, %c0_i32_0 : i32, i32
  }
  func.func @transform_5(%arg0: i32) -> (i32, i32) {
    %c0_i32 = arith.constant 0 : i32
    %c0_i32_0 = arith.constant 0 : i32
    %c0_i32_1 = arith.constant 0 : i32
    return %c0_i32, %c0_i32_0 : i32, i32
  }
  func.func @transform_6(%arg0: i32) -> (i32, i32) {
    %c0_i32 = arith.constant 0 : i32
    %c0_i32_0 = arith.constant 0 : i32
    %c0_i32_1 = arith.constant 0 : i32
    return %c0_i32, %c0_i32_0 : i32, i32
  }
  func.func @transform_7(%arg0: i32) -> (i32, i32) {
    %c0_i32 = arith.constant 0 : i32
    %c0_i32_0 = arith.constant 0 : i32
    return %arg0, %c0_i32 : i32, i32
  }
}

</mosaic_0001>

<bundles_post_ra>
// kernel: tpu_custom_call.1
= control target key start
LH: loop header
LB: loop body
LE: loop exit
PB: predicated region body
PF: predicated region fallthrough
CT: control target
= control target key end

     0   :  { %12 = vsyncpa [#allocation3], 0  ;;  %s464_s0 = inlined_call_operand.hbm [shape: f32[8,128], index: 0, kind: input, shape index: {}]   ;;  %s465_s1 = inlined_call_operand.hbm [shape: f32[128,128], index: 1, kind: input, shape index: {}]   ;;  %s466_s2 = inlined_call_operand.vmem [shape: f32[1,128], index: 2, kind: input, shape index: {}]   ;;  %s467_s3 = inlined_call_operand.hbm [shape: f32[128,128], index: 3, kind: input, shape index: {}]   ;;  %s468_s4 = inlined_call_operand.vmem [shape: f32[1,128], index: 4, kind: input, shape index: {}]   ;;  %s469_s5 = inlined_call_operand.hbm [shape: f32[128,128], index: 5, kind: input, shape index: {}]   ;;  %s470_s6 = inlined_call_operand.vmem [shape: f32[1,128], index: 6, kind: input, shape index: {}]   ;;  %s471_s7 = inlined_call_operand.hbm [shape: f32[8,128], index: 7, kind: output, shape index: {}]  }
   0x1   :  { %13 = vsyncpa [#allocation6], 0 }
   0x2   :  { %14 = vsyncpa [#allocation9], 0  ;;  %s31_s26 = sshll.u32 %s465_s1, 4  ;;  %s32_s26 = int_to_ptr.hbm [resolvable:$true] %s31_s26 }
   0x3   :  { %15 = vsyncpa [#allocation4], 0  ;;  %s393_s27 = smov [#allocation5]   ;;  %s21_s8 = sshll.u32 %s464_s0, 4  ;;  %s22_s8 = int_to_ptr.hbm [resolvable:$true] %s21_s8 }
   0x4   :  { %s33_s28 = sshll.u32 %s393_s27, 4  ;;  %s394_s9 = smov 128   ;;  %s34_s28 = int_to_ptr.vmem [resolvable:$true] %s33_s28 }
   0x5   :  { %s395_s10 = smov 8   ;;  %s396_s11 = smov [#allocation2]  }
   0x6   :  { %39 = dma.hbm_to_vmem [thread:$0]  %s32_s26, 2048, %s34_s28, [#allocation6], %s394_s9, %s394_s9, %s395_s10  }
   0x7   :  { %s23_s12 = sshll.u32 %s396_s11, 4  ;;  %s46_s15 = sshll.u32 %s467_s3, 4  ;;  %s24_s12 = int_to_ptr.vmem [resolvable:$true] %s23_s12  ;;  %s47_s15 = int_to_ptr.hbm [resolvable:$true] %s46_s15 }
   0x8   :  { %26 = dma.hbm_to_vmem [thread:$0]  %s22_s8, 128, %s24_s12, [#allocation3]  }
   0x9   :  { %s61_s17 = sshll.u32 %s469_s5, 4  ;;  %s397_s18 = smov [#allocation7]   ;;  %s62_s17 = int_to_ptr.hbm [resolvable:$true] %s61_s17 }
   0xa   :  { %s48_s19 = sshll.u32 %s397_s18, 4  ;;  %s398_s0 = smov [#allocation8]   ;;  %s49_s19 = int_to_ptr.vmem [resolvable:$true] %s48_s19 }
   0xb   :  { %54 = dma.hbm_to_vmem [thread:$0]  %s47_s15, 2048, %s49_s19, [#allocation6], %s394_s9, %s394_s9, %s395_s10  }
   0xc   :  { %s63_s20 = sshll.u32 %s398_s0, 4  ;;  %s64_s20 = int_to_ptr.vmem [resolvable:$true] %s63_s20 }
   0xd   :  { %69 = dma.hbm_to_vmem [thread:$0]  %s62_s17, 2048, %s64_s20, [#allocation9], %s394_s9, %s394_s9, %s395_s10  }
   0xe   :  { %385 = dma.done.wait [#allocation3], 128  }
   0xf   :  { %386 = vsyncadd [#allocation3], 4294967168 }
  0x10   :  { %387 = dma.done.wait [#allocation6], 4096  }
  0x11   :  { %388 = vsyncadd [#allocation6], 4294963200 }
  0x12   :  { %389 = dma.done.wait [#allocation9], 2048  }
  0x13   :  { %390 = vsyncadd [#allocation9], 4294965248  ;;  %v104_v0 = vld [vmem:[#allocation5 + $0x78] sm:$0xff]  ;;  %v103_v1 = vld [vmem:[#allocation5 + $0x70] sm:$0xff] }
  0x14   :  { %109 = vmatpush.msra.mxu0 %v104_v0  ;;  %v102_v2 = vld [vmem:[#allocation5 + $0x68] sm:$0xff]  ;;  %v101_v3 = vld [vmem:[#allocation5 + $0x60] sm:$0xff]  ;;  %v145_v4 = vld [vmem:[#allocation7 + $0x78] sm:$0xff] }
  0x15   :  { %v100_v5 = vld [vmem:[#allocation5 + $0x58] sm:$0xff]  ;;  %150 = vmatpush.msra.mxu1 %v145_v4  ;;  %v144_v6 = vld [vmem:[#allocation7 + $0x70] sm:$0xff]  ;;  %v143_v7 = vld [vmem:[#allocation7 + $0x68] sm:$0xff] }
  0x16   :  { %110 = vmatpush.msra.mxu0 %v103_v1  ;;  %v99_v8 = vld [vmem:[#allocation5 + $0x50] sm:$0xff]  ;;  %v142_v9 = vld [vmem:[#allocation7 + $0x60] sm:$0xff]  ;;  %v98_v10 = vld [vmem:[#allocation5 + $0x48] sm:$0xff] }
  0x17   :  { %151 = vmatpush.msra.mxu1 %v144_v6  ;;  %v141_v11 = vld [vmem:[#allocation7 + $0x58] sm:$0xff]  ;;  %v97_v12 = vld [vmem:[#allocation5 + $0x40] sm:$0xff]  ;;  %v140_v13 = vld [vmem:[#allocation7 + $0x50] sm:$0xff] }
  0x18   :  { %111 = vmatpush.msra.mxu0 %v102_v2  ;;  %v96_v14 = vld [vmem:[#allocation5 + $0x38] sm:$0xff]  ;;  %v139_v15 = vld [vmem:[#allocation7 + $0x48] sm:$0xff]  ;;  %v95_v16 = vld [vmem:[#allocation5 + $0x30] sm:$0xff] }
  0x19   :  { %152 = vmatpush.msra.mxu1 %v143_v7  ;;  %v138_v17 = vld [vmem:[#allocation7 + $0x40] sm:$0xff]  ;;  %v94_v18 = vld [vmem:[#allocation5 + $0x28] sm:$0xff]  ;;  %v137_v19 = vld [vmem:[#allocation7 + $0x38] sm:$0xff] }
  0x1a   :  { %112 = vmatpush.msra.mxu0 %v101_v3  ;;  %v93_v20 = vld [vmem:[#allocation5 + $0x20] sm:$0xff]  ;;  %v136_v21 = vld [vmem:[#allocation7 + $0x30] sm:$0xff]  ;;  %v92_v22 = vld [vmem:[#allocation5 + $0x18] sm:$0xff] }
  0x1b   :  { %153 = vmatpush.msra.mxu1 %v142_v9  ;;  %v135_v23 = vld [vmem:[#allocation7 + $0x28] sm:$0xff]  ;;  %v91_v24 = vld [vmem:[#allocation5 + $0x10] sm:$0xff]  ;;  %v134_v25 = vld [vmem:[#allocation7 + $0x20] sm:$0xff] }
  0x1c   :  { %113 = vmatpush.msra.mxu0 %v100_v5  ;;  %v90_v26 = vld [vmem:[#allocation5 + $0x8] sm:$0xff]  ;;  %v133_v27 = vld [vmem:[#allocation7 + $0x18] sm:$0xff]  ;;  %v89_v28 = vld [vmem:[#allocation5] sm:$0xff] }
  0x1d   :  { %154 = vmatpush.msra.mxu1 %v141_v11  ;;  %v88_v29 = vld [vmem:[#allocation2] sm:$0xff]  ;;  %v132_v30 = vld [vmem:[#allocation7 + $0x10] sm:$0xff]  ;;  %v131_v31 = vld [vmem:[#allocation7 + $0x8] sm:$0xff] }
  0x1e   :  { %114 = vmatpush.msra.mxu0 %v99_v8  ;;  %v130_v32 = vld [vmem:[#allocation7] sm:$0xff]  ;;  %v186_v33 = vld [vmem:[#allocation8 + $0x78] sm:$0xff]  ;;  %v185_v34 = vld [vmem:[#allocation8 + $0x70] sm:$0xff] }
  0x1f   :  { %155 = vmatpush.msra.mxu1 %v140_v13  ;;  %191 = vmatpush.msra.mxu2 %v186_v33  ;;  %v184_v35 = vld [vmem:[#allocation8 + $0x68] sm:$0xff]  ;;  %v183_v36 = vld [vmem:[#allocation8 + $0x60] sm:$0xff]  ;;  %v182_v37 = vld [vmem:[#allocation8 + $0x58] sm:$0xff] }
  0x20   :  { %115 = vmatpush.msra.mxu0 %v98_v10  ;;  %v181_v38 = vld [vmem:[#allocation8 + $0x50] sm:$0xff]  ;;  %v180_v39 = vld [vmem:[#allocation8 + $0x48] sm:$0xff]  ;;  %v179_v40 = vld [vmem:[#allocation8 + $0x40] sm:$0xff] }
  0x21   :  { %156 = vmatpush.msra.mxu1 %v139_v15  ;;  %192 = vmatpush.msra.mxu2 %v185_v34  ;;  %v178_v41 = vld [vmem:[#allocation8 + $0x38] sm:$0xff]  ;;  %v177_v42 = vld [vmem:[#allocation8 + $0x30] sm:$0xff]  ;;  %v176_v43 = vld [vmem:[#allocation8 + $0x28] sm:$0xff] }
  0x22   :  { %116 = vmatpush.msra.mxu0 %v97_v12  ;;  %v175_v44 = vld [vmem:[#allocation8 + $0x20] sm:$0xff]  ;;  %v174_v45 = vld [vmem:[#allocation8 + $0x18] sm:$0xff]  ;;  %v173_v50 = vld [vmem:[#allocation8 + $0x10] sm:$0xff] }
  0x23   :  { %157 = vmatpush.msra.mxu1 %v138_v17  ;;  %193 = vmatpush.msra.mxu2 %v184_v35  ;;  %v258_v46 = vld [vmem:[%s466_s2] ss:$0 sm:$0xff]  ;;  %v172_v51 = vld [vmem:[#allocation8 + $0x8] sm:$0xff]  ;;  %v171_v52 = vld [vmem:[#allocation8] sm:$0xff] }
  0x24   :  { %117 = vmatpush.msra.mxu0 %v96_v14  ;;  %v259_v53 = vld [vmem:[%s468_s4] ss:$0 sm:$0xff]  ;;  %s399_s4 = smov [#allocation10]  }
  0x25   :  { %158 = vmatpush.msra.mxu1 %v137_v19  ;;  %194 = vmatpush.msra.mxu2 %v183_v36  ;;  %v260_v57 = vld [vmem:[%s470_s6] ss:$0 sm:$0xff]  ;;  %s236_s24 = sshll.u32 %s399_s4, 4  ;;  %s238_s6 = sshll.u32 %s471_s7, 4  ;;  %s237_s24 = int_to_ptr.vmem [resolvable:$true] %s236_s24  ;;  %s239_s6 = int_to_ptr.hbm [resolvable:$true] %s238_s6 }
  0x26   :  { %118 = vmatpush.msra.mxu0 %v95_v16 }
  0x27   :  { %159 = vmatpush.msra.mxu1 %v136_v21  ;;  %195 = vmatpush.msra.mxu2 %v182_v37 }
  0x28   :  { %119 = vmatpush.msra.mxu0 %v94_v18 }
  0x29   :  { %160 = vmatpush.msra.mxu1 %v135_v23  ;;  %196 = vmatpush.msra.mxu2 %v181_v38 }
  0x2a   :  { %120 = vmatpush.msra.mxu0 %v93_v20 }
  0x2b   :  { %161 = vmatpush.msra.mxu1 %v134_v25  ;;  %197 = vmatpush.msra.mxu2 %v180_v39 }
  0x2c   :  { %121 = vmatpush.msra.mxu0 %v92_v22 }
  0x2d   :  { %162 = vmatpush.msra.mxu1 %v133_v27  ;;  %198 = vmatpush.msra.mxu2 %v179_v40 }
  0x2e   :  { %122 = vmatpush.msra.mxu0 %v91_v24 }
  0x2f   :  { %163 = vmatpush.msra.mxu1 %v132_v30  ;;  %199 = vmatpush.msra.mxu2 %v178_v41 }
  0x30   :  { %123 = vmatpush.msra.mxu0 %v90_v26 }
  0x31   :  { %164 = vmatpush.msra.mxu1 %v131_v31  ;;  %200 = vmatpush.msra.mxu2 %v177_v42 }
  0x32   :  { %124 = vmatpush.msra.mxu0 %v89_v28 }
  0x33   :  { %125 = vmatmul.f32.vlgmr.msra.gmra.mxu0 %v88_v29  ;;  %165 = vmatpush.msra.mxu1 %v130_v32 }
  0x34   :  { %201 = vmatpush.msra.mxu2 %v176_v43 }
  0x36   :  { %202 = vmatpush.msra.mxu2 %v175_v44 }
  0x38   :  { %203 = vmatpush.msra.mxu2 %v174_v45 }
  0x3a   :  { %204 = vmatpush.msra.mxu2 %v173_v50 }
  0x3c   :  { %205 = vmatpush.msra.mxu2 %v172_v51 }
  0x3e   :  { %206 = vmatpush.msra.mxu2 %v171_v52 }
  0xb0   :  { %v126_v47 = vpop.f32.mrf.mxu0 }
  0xb1   :  { %v127_v48 = vadd.f32 %v258_v46, %v126_v47 }
  0xb3   :  { %v129_v49 = vmax.f32 %v127_v48, 0.0 }
  0xb5   :  { %166 = vmatmul.f32.vlgmr.msra.gmra.mxu1 %v129_v49 }
 0x132   :  { %v167_v54 = vpop.f32.mrf.mxu1 }
 0x133   :  { %v168_v55 = vadd.f32 %v259_v53, %v167_v54 }
 0x135   :  { %v170_v56 = vmax.f32 %v168_v55, 0.0 }
 0x137   :  { %207 = vmatmul.f32.vlgmr.msra.gmra.mxu2 %v170_v56 }
 0x1ba   :  { %v208_v58 = vpop.f32.mrf.mxu2 }
 0x1bb   :  { %v209_v59 = vadd.f32 %v260_v57, %v208_v58 }
 0x1bd   :  { %v250_v60 = vmul.f32 -1.442695, %v209_v59 }
 0x1bf   :  { %261 = vpow2.f32 %v250_v60 }
 0x1c5   :  { %v262_v61 = vpop.eup %261 }
 0x1c6   :  { %v214_v62 = vadd.f32 1.0, %v262_v61 }
 0x1c8   :  { %263 = vrcp.f32 %v214_v62  ;;  %v226_v2 = vand.u32 2147483648, %v214_v62  ;;  %v224_v4 = vand.u32 2147483647, %v214_v62  ;;  %vm220_vm1 = vweird.f32 %v214_v62 }
 0x1ca   :  { %v227_v6 = vor.u32 1.1754944e-38, %v226_v2  ;;  %vm225_vm3 = vcmp.eq.f32.partialorder %v224_v4, 8.507059e+37 }
 0x1ce   :  { %v264_v63 = vpop.eup %263 }
 0x1cf   :  { %v216_v0 = vmul.f32 %v264_v63, %v214_v62  ;;  %vm221_vm0 = vweird.f32 %v264_v63 }
 0x1d0   :  { %vm222_vm2 = vmor %vm220_vm1, %vm221_vm0 }
 0x1d1   :  { %v217_v1 = vsub.f32 1.0, %v216_v0 }
 0x1d3   :  { %v218_v3 = vmul.f32 %v264_v63, %v217_v1 }
 0x1d5   :  { %v219_v5 = vadd.f32 %v264_v63, %v218_v3 }
 0x1d7   :  { %v223_v7 = vsel %vm222_vm2, %v264_v63, %v219_v5 }
 0x1d8   :  { %v228_v8 = vsel %vm225_vm3, %v227_v6, %v223_v7 }
 0x1d9   :  { %230 = vst [vmem:[#allocation10] sm:$0xff] %v228_v8 }
 0x1da   :  { %241 = dma.vmem_to_hbm [thread:$0]  %s237_s24, 128, %s239_s6, [#allocation4]  }
 0x1db   :  { %391 = dma.done.wait [#allocation4], 128  }
 0x1dc   :  { %392 = vsyncadd [#allocation4], 4294967168 }
 0x1dd   :  { %246 = vsyncpa [#allocation3], 1 }
 0x1de   :  { %247 = vsyncpa [#allocation6], 1 }
 0x1df   :  { %248 = vsyncpa [#allocation9], 1 }
 0x1e0   :  { %249 = vsyncpa [#allocation4], 1 }

</bundles_post_ra>
